<compile_context>
chip_gen: v6e
topology: v6e:2x2x1
jax: 0.10.0
libtpu: 0.0.40
codegen_flags: <defaults>
</compile_context>

<pallas_src>
import functools

import jax
import jax.numpy as jnp
from jax.experimental import pallas as pl
from jax.experimental.pallas import tpu as pltpu


def _bn_pad_kernel(scale_ref, shift_ref, x_ref, o_ref, *, pad):
    """One grid step == one batch plane, CB channels.

    scale_ref, shift_ref : VMEM f32 (CB, 1, 1)
    x_ref                : VMEM (CB, H, W)
    o_ref                : VMEM (CB, H + 2*pad, W + 2*pad)
    """
    s = scale_ref[...]                       # (CB, 1, 1)
    b = shift_ref[...]                       # (CB, 1, 1)
    y = (x_ref[...].astype(jnp.float32) * s + b).astype(o_ref.dtype)

    if pad == 0:
        o_ref[...] = y
        return

    cb, h, w = x_ref.shape
    wp = w + 2 * pad
    border = b.astype(o_ref.dtype)           # (CB, 1, 1)

    # Border value broadcasts (hoisted; each built once per block).
    tb = jnp.broadcast_to(border, (cb, pad, wp))   # top / bottom rows
    lr = jnp.broadcast_to(border, (cb, h, pad))    # left / right columns

    # Single-pass store: every output element written exactly once.
    o_ref[:, pl.ds(0, pad), :] = tb                       # top pad rows
    o_ref[:, pl.ds(h + pad, pad), :] = tb                 # bottom pad rows
    o_ref[:, pl.ds(pad, h), pl.ds(0, pad)] = lr           # left pad cols
    o_ref[:, pl.ds(pad, h), pl.ds(w + pad, pad)] = lr     # right pad cols
    o_ref[:, pl.ds(pad, h), pl.ds(pad, w)] = y            # interior


def _pick_channel_block(C, per_channel_out_bytes, budget_bytes=6 << 20):
    """Largest divisor of C whose output block stays under the VMEM budget."""
    cb = 1
    for d in range(1, C + 1):
        if C % d == 0 and d * per_channel_out_bytes <= budget_bytes:
            cb = d
    return cb


def bn_and_pad(x, weight, bias, running_mean, running_var, *, eps=1e-5,
               pad_pixels=1, affine=True):
    """x: [N, C, H, W] -> [N, C, H+2p, W+2p] (eval-mode BN + value-padded border)."""
    N, C, H, W = x.shape
    pad = int(pad_pixels)
    Hp, Wp = H + 2 * pad, W + 2 * pad

    rm = running_mean.astype(jnp.float32)
    rv = running_var.astype(jnp.float32)
    inv_std = jax.lax.rsqrt(rv + jnp.float32(eps))
    if affine:
        scale = weight.astype(jnp.float32) * inv_std
        shift = bias.astype(jnp.float32) - rm * scale
    else:
        scale = inv_std
        shift = -rm * inv_std
    scale3 = scale.reshape(C, 1, 1)
    shift3 = shift.reshape(C, 1, 1)

    itemsize = jnp.dtype(x.dtype).itemsize
    CB = _pick_channel_block(C, Hp * Wp * itemsize)
    # Keep >= 2 grid steps when possible so both v7x TensorCores get work
    # (and the pipeline actually overlaps).
    if N * (C // CB) < 2 and CB > 1:
        for d in range(CB - 1, 0, -1):
            if C % d == 0:
                CB = d
                break

    grid = (N, C // CB)

    in_block_bytes = CB * H * W * itemsize
    out_block_bytes = CB * Hp * Wp * itemsize
    vmem_need = 2 * (in_block_bytes + out_block_bytes) + 4 * C * 4 + (2 << 20)
    vmem_limit = int(min(max(vmem_need, 32 << 20), 128 << 20))

    kernel = functools.partial(_bn_pad_kernel, pad=pad)

    cost = pl.CostEstimate(
        flops=2 * N * C * H * W,
        transcendentals=0,
        bytes_accessed=(N * C * H * W + N * C * Hp * Wp) * itemsize,
    )

    return pl.pallas_call(
        kernel,
        out_shape=jax.ShapeDtypeStruct((N, C, Hp, Wp), x.dtype),
        grid=grid,
        in_specs=[
            pl.BlockSpec((CB, 1, 1), lambda n, c: (c, 0, 0)),          # scale
            pl.BlockSpec((CB, 1, 1), lambda n, c: (c, 0, 0)),          # shift
            pl.BlockSpec((None, CB, H, W), lambda n, c: (n, c, 0, 0)),  # x
        ],
        out_specs=pl.BlockSpec((None, CB, Hp, Wp), lambda n, c: (n, c, 0, 0)),
        compiler_params=pltpu.CompilerParams(
            dimension_semantics=("parallel", "parallel"),
            vmem_limit_bytes=vmem_limit,
        ),
        cost_estimate=cost,
    )(scale3, shift3, x)


def bn_and_pad_ref(x, weight, bias, running_mean, running_var, eps, pad,
                   affine=True):
    """Pure-JAX reference mirroring the PyTorch forward (eval mode)."""
    inv_std = 1.0 / jnp.sqrt(running_var + eps)
    if affine:
        w = (weight * inv_std)[None, :, None, None]
        y = (x - running_mean[None, :, None, None]) * w + bias[None, :, None, None]
        pad_values = bias - running_mean * weight * inv_std
    else:
        y = (x - running_mean[None, :, None, None]) * inv_std[None, :, None, None]
        pad_values = -running_mean * inv_std
    if pad > 0:
        pv = pad_values[None, :, None, None]
        y = jnp.pad(y, ((0, 0), (0, 0), (pad, pad), (pad, pad)))
        y = y.at[:, :, :pad, :].set(pv)
        y = y.at[:, :, -pad:, :].set(pv)
        y = y.at[:, :, :, :pad].set(pv)
        y = y.at[:, :, :, -pad:].set(pv)
    return y


if __name__ == "__main__":
    N, C, H, W = 2, 4, 16, 16
    pad_pixels = 1
    eps = 1e-5

    key = jax.random.PRNGKey(0)
    k1, k2, k3, k4, k5 = jax.random.split(key, 5)
    x = jax.random.normal(k1, (N, C, H, W), dtype=jnp.float32)
    weight = jax.random.normal(k2, (C,), dtype=jnp.float32) * 0.5 + 1.0
    bias = jax.random.normal(k3, (C,), dtype=jnp.float32) * 0.1
    running_mean = jax.random.normal(k4, (C,), dtype=jnp.float32) * 0.2
    running_var = jax.random.uniform(k5, (C,), dtype=jnp.float32,
                                     minval=0.5, maxval=1.5)

    # Affine BN path.
    out = bn_and_pad(x, weight, bias, running_mean, running_var,
                     eps=eps, pad_pixels=pad_pixels, affine=True)
    out = jax.block_until_ready(out)
    ref = bn_and_pad_ref(x, weight, bias, running_mean, running_var,
                         eps, pad_pixels, affine=True)
    assert out.shape == (N, C, H + 2 * pad_pixels, W + 2 * pad_pixels)
    assert out.dtype == x.dtype
    assert jnp.allclose(out, ref, atol=1e-5, rtol=1e-5), "affine mismatch"

    # affine=False path (pad_value = -mean / sqrt(var + eps)).
    out_na = bn_and_pad(x, None, None, running_mean, running_var,
                        eps=eps, pad_pixels=pad_pixels, affine=False)
    out_na = jax.block_until_ready(out_na)
    ref_na = bn_and_pad_ref(x, None, None, running_mean, running_var,
                            eps, pad_pixels, affine=False)
    assert jnp.allclose(out_na, ref_na, atol=1e-5, rtol=1e-5), "non-affine mismatch"

    print("KERNEL_OK")
</pallas_src>

<mosaic_0001>
module attributes {stable_mosaic.version = 11 : i64} {
  func.func @_bn_pad_kernel(%arg0: i32, %arg1: i32, %arg2: memref<4x1x1xf32, #tpu.memory_space<vmem>>, %arg3: memref<4x1x1xf32, #tpu.memory_space<vmem>>, %arg4: memref<1x4x16x16xf32, #tpu.memory_space<vmem>>, %arg5: memref<1x4x18x18xf32, #tpu.memory_space<vmem>>) attributes {dimension_semantics = [#tpu.dimension_semantics<parallel>, #tpu.dimension_semantics<parallel>], iteration_bounds = array<i64: 2, 1>, scalar_prefetch = 0 : i64, scratch_operands = 0 : i64, tpu.core_type = #tpu.core_type<tc>, window_params = [{transform_indices = @transform_0, window_bounds = array<i64: 4, 1, 1>}, {transform_indices = @transform_1, window_bounds = array<i64: 4, 1, 1>}, {transform_indices = @transform_2, window_bounds = array<i64: 1, 4, 16, 16>}, {transform_indices = @transform_3, window_bounds = array<i64: 1, 4, 18, 18>}]} {
    %c0 = arith.constant 0 : index
    %c0_0 = arith.constant 0 : index
    %c0_1 = arith.constant 0 : index
    %0 = vector.load %arg2[%c0, %c0_0, %c0_1] : memref<4x1x1xf32, #tpu.memory_space<vmem>>, vector<4x1x1xf32>
    %c0_2 = arith.constant 0 : index
    %c0_3 = arith.constant 0 : index
    %c0_4 = arith.constant 0 : index
    %1 = vector.load %arg3[%c0_2, %c0_3, %c0_4] : memref<4x1x1xf32, #tpu.memory_space<vmem>>, vector<4x1x1xf32>
    %c0_5 = arith.constant 0 : index
    %c0_6 = arith.constant 0 : index
    %c0_7 = arith.constant 0 : index
    %c0_8 = arith.constant 0 : index
    %2 = vector.load %arg4[%c0_5, %c0_6, %c0_7, %c0_8] : memref<1x4x16x16xf32, #tpu.memory_space<vmem>>, vector<1x4x16x16xf32>
    %3 = vector.shape_cast %2 : vector<1x4x16x16xf32> to vector<4x16x16xf32>
    %4 = vector.broadcast %0 : vector<4x1x1xf32> to vector<4x16x16xf32>
    %5 = arith.mulf %3, %4 : vector<4x16x16xf32>
    %6 = vector.broadcast %1 : vector<4x1x1xf32> to vector<4x16x16xf32>
    %7 = arith.addf %5, %6 : vector<4x16x16xf32>
    %8 = vector.shape_cast %1 : vector<4x1x1xf32> to vector<4x1x1xf32>
    %9 = vector.broadcast %8 : vector<4x1x1xf32> to vector<4x1x18xf32>
    %10 = vector.shape_cast %1 : vector<4x1x1xf32> to vector<4x1x1xf32>
    %11 = vector.broadcast %10 : vector<4x1x1xf32> to vector<4x16x1xf32>
    %c0_9 = arith.constant 0 : index
    %c0_10 = arith.constant 0 : index
    %c0_11 = arith.constant 0 : index
    %c0_12 = arith.constant 0 : index
    %12 = vector.load %arg5[%c0_9, %c0_10, %c0_11, %c0_12] : memref<1x4x18x18xf32, #tpu.memory_space<vmem>>, vector<1x4x1x18xf32>
    %13 = vector.shape_cast %12 : vector<1x4x1x18xf32> to vector<4x1x18xf32>
    %14 = vector.shape_cast %9 : vector<4x1x18xf32> to vector<1x4x1x18xf32>
    tpu.vector_store %arg5[%c0_9, %c0_10, %c0_11, %c0_12], %14 {strides = array<i32>} : memref<1x4x18x18xf32, #tpu.memory_space<vmem>>, vector<1x4x1x18xf32>,
    %c0_13 = arith.constant 0 : index
    %c0_14 = arith.constant 0 : index
    %c17 = arith.constant 17 : index
    %c0_15 = arith.constant 0 : index
    %15 = vector.load %arg5[%c0_13, %c0_14, %c17, %c0_15] : memref<1x4x18x18xf32, #tpu.memory_space<vmem>>, vector<1x4x1x18xf32>
    %16 = vector.shape_cast %15 : vector<1x4x1x18xf32> to vector<4x1x18xf32>
    %17 = vector.shape_cast %9 : vector<4x1x18xf32> to vector<1x4x1x18xf32>
    tpu.vector_store %arg5[%c0_13, %c0_14, %c17, %c0_15], %17 {strides = array<i32>} : memref<1x4x18x18xf32, #tpu.memory_space<vmem>>, vector<1x4x1x18xf32>,
    %c0_16 = arith.constant 0 : index
    %c0_17 = arith.constant 0 : index
    %c1 = arith.constant 1 : index
    %c0_18 = arith.constant 0 : index
    %18 = vector.load %arg5[%c0_16, %c0_17, %c1, %c0_18] : memref<1x4x18x18xf32, #tpu.memory_space<vmem>>, vector<1x4x16x1xf32>
    %19 = vector.shape_cast %18 : vector<1x4x16x1xf32> to vector<4x16x1xf32>
    %20 = vector.shape_cast %11 : vector<4x16x1xf32> to vector<1x4x16x1xf32>
    tpu.vector_store %arg5[%c0_16, %c0_17, %c1, %c0_18], %20 {strides = array<i32>} : memref<1x4x18x18xf32, #tpu.memory_space<vmem>>, vector<1x4x16x1xf32>,
    %c0_19 = arith.constant 0 : index
    %c0_20 = arith.constant 0 : index
    %c1_21 = arith.constant 1 : index
    %c17_22 = arith.constant 17 : index
    %21 = vector.load %arg5[%c0_19, %c0_20, %c1_21, %c17_22] : memref<1x4x18x18xf32, #tpu.memory_space<vmem>>, vector<1x4x16x1xf32>
    %22 = vector.shape_cast %21 : vector<1x4x16x1xf32> to vector<4x16x1xf32>
    %23 = vector.shape_cast %11 : vector<4x16x1xf32> to vector<1x4x16x1xf32>
    tpu.vector_store %arg5[%c0_19, %c0_20, %c1_21, %c17_22], %23 {strides = array<i32>} : memref<1x4x18x18xf32, #tpu.memory_space<vmem>>, vector<1x4x16x1xf32>,
    %c0_23 = arith.constant 0 : index
    %c0_24 = arith.constant 0 : index
    %c1_25 = arith.constant 1 : index
    %c1_26 = arith.constant 1 : index
    %24 = vector.load %arg5[%c0_23, %c0_24, %c1_25, %c1_26] : memref<1x4x18x18xf32, #tpu.memory_space<vmem>>, vector<1x4x16x16xf32>
    %25 = vector.shape_cast %24 : vector<1x4x16x16xf32> to vector<4x16x16xf32>
    %26 = vector.shape_cast %7 : vector<4x16x16xf32> to vector<1x4x16x16xf32>
    tpu.vector_store %arg5[%c0_23, %c0_24, %c1_25, %c1_26], %26 {strides = array<i32>} : memref<1x4x18x18xf32, #tpu.memory_space<vmem>>, vector<1x4x16x16xf32>,
    return
  }
  func.func @transform_0(%arg0: i32, %arg1: i32) -> (i32, i32, i32) {
    %c0_i32 = arith.constant 0 : i32
    %c0_i32_0 = arith.constant 0 : i32
    %c0_i32_1 = arith.constant 0 : i32
    return %arg1, %c0_i32, %c0_i32_0 : i32, i32, i32
  }
  func.func @transform_1(%arg0: i32, %arg1: i32) -> (i32, i32, i32) {
    %c0_i32 = arith.constant 0 : i32
    %c0_i32_0 = arith.constant 0 : i32
    %c0_i32_1 = arith.constant 0 : i32
    return %arg1, %c0_i32, %c0_i32_0 : i32, i32, i32
  }
  func.func @transform_2(%arg0: i32, %arg1: i32) -> (i32, i32, i32, i32) {
    %c0_i32 = arith.constant 0 : i32
    %c0_i32_0 = arith.constant 0 : i32
    %c0_i32_1 = arith.constant 0 : i32
    return %arg0, %arg1, %c0_i32, %c0_i32_0 : i32, i32, i32, i32
  }
  func.func @transform_3(%arg0: i32, %arg1: i32) -> (i32, i32, i32, i32) {
    %c0_i32 = arith.constant 0 : i32
    %c0_i32_0 = arith.constant 0 : i32
    %c0_i32_1 = arith.constant 0 : i32
    return %arg0, %arg1, %c0_i32, %c0_i32_0 : i32, i32, i32, i32
  }
}

</mosaic_0001>

<bundles_post_ra>
// kernel: tpu_custom_call.1
= control target key start
LH: loop header
LB: loop body
LE: loop exit
PB: predicated region body
PF: predicated region fallthrough
CT: control target
= control target key end

     0   :  { %8 = vsyncpa [#allocation3], 0  ;;  %s999_s0 = inlined_call_operand.vmem [shape: f32[4,1,1], index: 0, kind: input, shape index: {}]   ;;  %s1000_s1 = inlined_call_operand.vmem [shape: f32[4,1,1], index: 1, kind: input, shape index: {}]   ;;  %s1001_s2 = inlined_call_operand.hbm [shape: f32[2,4,16,16], index: 2, kind: input, shape index: {}]   ;;  %s1002_s3 = inlined_call_operand.vmem [shape: f32[2,4,18,18], index: 3, kind: output, shape index: {}]  }
   0x1   :  { %10 = vsyncpa [#allocation3 + $0x1], 0  ;;  %s793_s12 = smov 0   ;;  %s795_s13 = smov 0  }
   0x2   :  { %s797_s14 = smov 0   ;;  %s799_s15 = smov 0  }
   0x3   :  { %s801_s16 = smov 0   ;;  %s803_s17 = smov 0  }
   0x4 LB: > { %s605_s18 = sadd.s32 4294967295, %s765_s17   ;;  %s28_s19 = sadd.s32 1, %s761_s16  ;;  %s765_s17 = sphi %s803_s17, %s16_s17   ;;  %s761_s16 = sphi %s801_s16, %s1010_s16   ;;  %s757_s15 = sphi %s799_s15, %s1009_s15   ;;  %s753_s14 = sphi %s797_s14, %s1008_s14   ;;  %s749_s13 = sphi %s795_s13, %s1007_s13   ;;  %s745_s12 = sphi %s793_s12, %s1006_s12  }
   0x5   : > { %p30_p0 = scmp.ge.s32.totalorder %s28_s19, 2  ;;  %s89_s20 = sadd.s32 1, %s753_s14 }
   0x6   : > { %p96_p1 = scmp.ne.s32.totalorder %s753_s14, %s749_s13  ;;  %p97_p2 = scmp.eq.s32.totalorder %s765_s17, 0 }
   0x7   : > { %s1012_s19 = smov (%p30_p0, %s28_s19), 0  ;;  %p102_p4 = scmp.ne.s32.totalorder %s749_s13, %s745_s12 }
   0x8   : > { %p829_p3 = por %p97_p2, %p96_p1  ;;  %s84_s22 = ssub.s32 %s761_s16, %s1012_s19 }
   0x9   : > { %p103_p5 = scmp.eq.s32.totalorder %s605_s18, 0  ;;  %p87_p6 = scmp.eq.s32.totalorder %s84_s22, 0 }
   0xa   : > { %p631_p8 = scmp.lt.s32.totalorder %s765_s17, 2  ;;  %s170_s25 = sand.u32 1, %s753_s14  }
   0xb   : > { %p836_p7 = por %p103_p5, %p102_p4  ;;  %s623_s26 = sshll.u32 %s761_s16, 10 }
   0xc   : > { %s842_s24 = scalar_select %p87_p6, %s753_s14, %s89_s20  }
   0xd   : > { %s611_s27 = sshll.u32 %s170_s25, 6  ;;  %s183_s30 = scalar_lea.hbm %s1001_s2, %s623_s26 }
   0xe   : > { %s174_s4 = scalar_lea.vmem [#allocation2], %s611_s27  ;;  %p851_p9 = pnand %p631_p8, %p829_p3 }
   0xf   : > { %s184_s5 = sshll.u32 %s174_s4, 4  ;;  %s171_s7 = scalar_lea.sflag [#allocation3], %s170_s25  ;;  %s185_s5 = int_to_ptr.vmem [resolvable:$true] %s184_s5 }
  0x10   : > { %p689_p10 = pneg %p851_p9  ;;  %s700_s8 = scalar_lea.vmem %s185_s5, 1024 }
  0x11   : > { %p701_p11 = scmp.ne.s32.totalorder %s185_s5, %s700_s8  ;;  %s767_s9 = smov [#allocation2]  }
  0x12   : > { %s705_s10 = sshll.u32 %s767_s9, 4  ;;  %s706_s10 = int_to_ptr.vmem [resolvable:$false] %s705_s10 }
  0x13   : > { %p703_p12 = pnand %p701_p11, %p689_p10  ;;  %s707_s11 = scalar_lea.vmem %s706_s10, 2048 }
  0x14   : > { %p708_p0 = scmp.lt.s32.totalorder %s185_s5, %s706_s10  ;;  %p709_p1 = scmp.lt.s32.totalorder %s707_s11, %s700_s8 }
  0x15   : > { %p704_p13 = pneg %p703_p12 }
  0x16   : > { %p710_p2 = por %p709_p1, %p708_p0 }
  0x18   : > { %p711_p3 = pnand %p710_p2, %p704_p13 }
  0x1a   : > { %714 = shalt.err (!%p711_p3)
}
  0x1b   : > { %s768_s12 = smov 128   ;;  %s769_s18 = smov 8  }
  0x1c   : > { %630 = dma.hbm_to_vmem [thread:$0]  (!%p851_p9), %s183_s30, 1024, %s185_s5, %s171_s7, %s768_s12, %s768_s12, %s769_s18  }
  0x1d   : > { %p614_p4 = scmp.ge.s32.totalorder %s765_s17, 1  ;;  %p192_p5 = scmp.lt.s32.totalorder %s765_s17, 3 }
  0x1f   : > { %p193_p6 = pnand %p614_p4, %p192_p5 }
  0x20   : > { %s198_s20 = sand.u32 (!%p193_p6), 1, %s749_s13  }
  0x21   : > { %196 = sbr.rel (%p193_p6) target bundleno = 303 (0x12f), region = 32  ;;  %s615_s21 = sshll.u32 (!%p193_p6), %s198_s20, 6 }
  0x22   : > { %s199_s22 = scalar_lea.sflag (!%p193_p6), [#allocation3], %s198_s20  ;;  %s862_s25 = scalar_lea.vmem (!%p193_p6), [#allocation2], %s615_s21 }
  0x26   : > { %740 = dma.done.wait (%p836_p7), %s199_s22, 1024  }
  0x27   : > { %742 = vsyncadd (%p836_p7), %s199_s22, 4294966272  ;;  %v324_v0 = vlaneseq  ;;  %v770_v1 = vmov 0   ;;  %v619_v3 = vld [vmem:[%s999_s0 + $0x2] ss:$0 sm:$0xff]  ;;  %v617_v4 = vld [vmem:[%s999_s0] ss:$0 sm:$0xff] }
  0x28   : > { %686 = vset.pattern.permute.xlu1 %v770_v1  ;;  %685 = vset.pattern.permute.xlu0 %v770_v1  ;;  %v620_v5 = vld [vmem:[%s999_s0 + $0x3] ss:$0 sm:$0xff]  ;;  %v618_v7 = vld [vmem:[%s999_s0 + $0x1] ss:$0 sm:$0xff]  ;;  %v264_v9 = vld [vmem:[%s1000_s1] sm:$0x1] }
  0x29   : > { %v325_v2 = vshrl.u32 %v324_v0, 7  ;;  %305 = vperm.xlu1 %686, %v619_v3   ;;  %297 = vperm.xlu0 %685, %v617_v4   ;;  %v265_v8 = vld [vmem:[%s1000_s1 + $0x1] sm:$0x1]  ;;  %v267_v12 = vld [vmem:[%s1000_s1 + $0x3] sm:$0x1]  ;;  %p250_p7 = scmp.lt.s32.totalorder %s757_s15, 1 }
  0x2a   : > { %v266_v13 = vld [vmem:[%s1000_s1 + $0x2] sm:$0x1]  ;;  %vm409_vm0 = vcmask 7168   ;;  %v269_v19 = vld [vmem:[%s862_s25 + $0x8] sm:$0xff]  ;;  %v270_v24 = vld [vmem:[%s862_s25 + $0x10] sm:$0xff]  ;;  %s772_s27 = smov 1  }
  0x2b   : > { %v877_v6 = vsub.s32 0, %v325_v2  ;;  %s1014_s15 = smov (!%p250_p7, %s757_s15), 1  ;;  %v268_v18 = vld [vmem:[%s862_s25] sm:$0xff]  ;;  %v271_v25 = vld [vmem:[%s862_s25 + $0x18] sm:$0xff]  ;;  %v273_v33 = vld [vmem:[%s862_s25 + $0x28] sm:$0xff]  ;;  %vm396_vm1 = vcmask 139264  }
  0x2c   : > { %s624_s20 = smul.u32 96, %s1014_s15  ;;  %s771_s15 = smov 17   ;;  %v272_v32 = vld [vmem:[%s862_s25 + $0x20] sm:$0xff]  ;;  %v274_v40 = vld [vmem:[%s862_s25 + $0x30] sm:$0xff]  ;;  %v275_v41 = vld [vmem:[%s862_s25 + $0x38] sm:$0xff]  ;;  %vm430_vm2 = vcmask 146568  }
  0x2d   : > { %309 = vperm.xlu1 %686, %v620_v5   ;;  %301 = vperm.xlu0 %685, %v618_v7   ;;  %v331_v10 = vrot.slane %v265_v8, %v877_v6  ;;  %v327_v11 = vrot.slane %v264_v9, %v877_v6  ;;  %v339_v14 = vrot.slane %v267_v12, %v877_v6  ;;  %vm471_vm3 = vcmask 138248  }
  0x2e   : > { %v335_v15 = vrot.slane %v266_v13, %v877_v6  ;;  %s903_s26 = scalar_lea.vmem %s1002_s3, %s624_s20 }
  0x2f   : > { %412 = vst.msk [vmem:[%s903_s26 + $0x19] sm:$0xff] %vm409_vm0, %v331_v10  ;;  %413 = vst.msk [vmem:[%s903_s26 + $0x21] sm:$0xff] %vm409_vm0, %v331_v10 }
  0x30   : > { %410 = vst.msk [vmem:[%s903_s26 + $0x1] sm:$0xff] %vm409_vm0, %v327_v11  ;;  %411 = vst.msk [vmem:[%s903_s26 + $0x9] sm:$0xff] %vm409_vm0, %v327_v11 }
  0x31   : > { %345 = vperm.xlu1 %686, %v331_v10   ;;  %341 = vperm.xlu0 %685, %v327_v11   ;;  %414 = vst.msk [vmem:[%s903_s26 + $0x31] sm:$0xff] %vm409_vm0, %v335_v15  ;;  %415 = vst.msk [vmem:[%s903_s26 + $0x39] sm:$0xff] %vm409_vm0, %v335_v15 }
  0x32   : > { %416 = vst.msk [vmem:[%s903_s26 + $0x49] sm:$0xff] %vm409_vm0, %v339_v14  ;;  %417 = vst.msk [vmem:[%s903_s26 + $0x51] sm:$0xff] %vm409_vm0, %v339_v14 }
  0x35   : > { %353 = vperm.xlu1 %686, %v339_v14   ;;  %349 = vperm.xlu0 %685, %v335_v15  }
  0x39   : > { %373 = vperm.xlu1 %686, %v265_v8   ;;  %365 = vperm.xlu0 %685, %v264_v9  }
  0x3d   : > { %389 = vperm.xlu1 %686, %v267_v12   ;;  %381 = vperm.xlu0 %685, %v266_v13  }
  0x41   : > { %420 = vrot.lane.b32.xlu1 %v331_v10, %s771_s15  ;;  %418 = vrot.lane.b32.xlu0 %v327_v11, %s771_s15 }
  0x45   : > { %424 = vrot.lane.b32.xlu1 %v339_v14, %s771_s15  ;;  %422 = vrot.lane.b32.xlu0 %v335_v15, %s771_s15 }
  0xa4   : > { %v306_v16 = vpop.permute.xlu1 %305  ;;  %v298_v17 = vpop.permute.xlu0 %297 }
  0xa5   : > { %v312_v22 = vmul.f32 %v298_v17, %v268_v18  ;;  %v313_v23 = vmul.f32 %v298_v17, %v269_v19  ;;  %v316_v38 = vmul.f32 %v306_v16, %v272_v32  ;;  %v317_v39 = vmul.f32 %v306_v16, %v273_v33 }
  0xa8   : > { %v310_v20 = vpop.permute.xlu1 %309  ;;  %v302_v21 = vpop.permute.xlu0 %301 }
  0xa9   : > { %v314_v30 = vmul.f32 %v302_v21, %v270_v24  ;;  %v315_v31 = vmul.f32 %v302_v21, %v271_v25  ;;  %v318_v48 = vmul.f32 %v310_v20, %v274_v40  ;;  %v319_v49 = vmul.f32 %v310_v20, %v275_v41 }
  0xac   : > { %v346_v26 = vpop.permute.xlu1 %345  ;;  %v342_v27 = vpop.permute.xlu0 %341 }
  0xad   : > { %v356_v28 = vadd.f32 %v342_v27, %v312_v22  ;;  %v357_v29 = vadd.f32 %v342_v27, %v313_v23  ;;  %v358_v36 = vadd.f32 %v346_v26, %v314_v30  ;;  %v359_v37 = vadd.f32 %v346_v26, %v315_v31 }
  0xaf   : > { %449 = vrot.lane.b32.xlu1 %v357_v29, %s772_s27  ;;  %447 = vrot.lane.b32.xlu0 %v356_v28, %s772_s27 }
  0xb0   : > { %v354_v34 = vpop.permute.xlu1 %353  ;;  %v350_v35 = vpop.permute.xlu0 %349 }
  0xb1   : > { %v360_v44 = vadd.f32 %v350_v35, %v316_v38  ;;  %v361_v45 = vadd.f32 %v350_v35, %v317_v39  ;;  %v362_v52 = vadd.f32 %v354_v34, %v318_v48  ;;  %v363_v53 = vadd.f32 %v354_v34, %v319_v49 }
  0xb3   : > { %453 = vrot.lane.b32.xlu1 %v359_v37, %s772_s27  ;;  %451 = vrot.lane.b32.xlu0 %v358_v36, %s772_s27 }
  0xb4   : > { %v374_v42 = vpop.permute.xlu1 %373  ;;  %v366_v43 = vpop.permute.xlu0 %365 }
  0xb5   : > { %v379_v46 = vrot.slane %v374_v42, %v877_v6  ;;  %v371_v47 = vrot.slane %v366_v43, %v877_v6 }
  0xb7   : > { %398 = vst.msk [vmem:[%s903_s26 + $0x18] sm:$0x1] %vm396_vm1, %v379_v46  ;;  %402 = vst.msk [vmem:[%s903_s26 + $0x29] sm:$0x1] %vm396_vm1, %v379_v46  ;;  %457 = vrot.lane.b32.xlu1 %v361_v45, %s772_s27  ;;  %455 = vrot.lane.b32.xlu0 %v360_v44, %s772_s27 }
  0xb8   : > { %397 = vst.msk [vmem:[%s903_s26] sm:$0x1] %vm396_vm1, %v371_v47  ;;  %401 = vst.msk [vmem:[%s903_s26 + $0x11] sm:$0x1] %vm396_vm1, %v371_v47  ;;  %v390_v50 = vpop.permute.xlu1 %389  ;;  %v382_v51 = vpop.permute.xlu0 %381 }
  0xb9   : > { %v395_v54 = vrot.slane %v390_v50, %v877_v6  ;;  %v387_v55 = vrot.slane %v382_v51, %v877_v6 }
  0xbb   : > { %400 = vst.msk [vmem:[%s903_s26 + $0x48] sm:$0x1] %vm396_vm1, %v395_v54  ;;  %404 = vst.msk [vmem:[%s903_s26 + $0x59] sm:$0x1] %vm396_vm1, %v395_v54  ;;  %461 = vrot.lane.b32.xlu1 %v363_v53, %s772_s27  ;;  %459 = vrot.lane.b32.xlu0 %v362_v52, %s772_s27 }
  0xbc   : > { %399 = vst.msk [vmem:[%s903_s26 + $0x30] sm:$0x1] %vm396_vm1, %v387_v55  ;;  %403 = vst.msk [vmem:[%s903_s26 + $0x41] sm:$0x1] %vm396_vm1, %v387_v55  ;;  %v421_v56 = vpop.permute.xlu1 %420  ;;  %v419_v57 = vpop.permute.xlu0 %418 }
  0xbd   : > { %433 = vst.msk [vmem:[%s903_s26 + $0x19] sm:$0xff] %vm430_vm2, %v421_v56  ;;  %434 = vst.msk [vmem:[%s903_s26 + $0x21] sm:$0xff] %vm430_vm2, %v421_v56 }
  0xbe   : > { %431 = vst.msk [vmem:[%s903_s26 + $0x1] sm:$0xff] %vm430_vm2, %v419_v57  ;;  %432 = vst.msk [vmem:[%s903_s26 + $0x9] sm:$0xff] %vm430_vm2, %v419_v57 }
  0xc0   : > { %v425_v58 = vpop.permute.xlu1 %424  ;;  %v423_v59 = vpop.permute.xlu0 %422 }
  0xc1   : > { %437 = vst.msk [vmem:[%s903_s26 + $0x49] sm:$0xff] %vm430_vm2, %v425_v58  ;;  %438 = vst.msk [vmem:[%s903_s26 + $0x51] sm:$0xff] %vm430_vm2, %v425_v58 }
  0xc2   : > { %435 = vst.msk [vmem:[%s903_s26 + $0x31] sm:$0xff] %vm430_vm2, %v423_v59  ;;  %436 = vst.msk [vmem:[%s903_s26 + $0x39] sm:$0xff] %vm430_vm2, %v423_v59 }
 0x121   : > { %v450_v60 = vpop.permute.xlu1 %449  ;;  %v448_v61 = vpop.permute.xlu0 %447 }
 0x122   : > { %473 = vst.msk [vmem:[%s903_s26 + $0x9] sm:$0xff] %vm471_vm3, %v450_v60  ;;  %472 = vst.msk [vmem:[%s903_s26 + $0x1] sm:$0xff] %vm471_vm3, %v448_v61 }
 0x125   : > { %v454_v62 = vpop.permute.xlu1 %453  ;;  %v452_v63 = vpop.permute.xlu0 %451 }
 0x126   : > { %475 = vst.msk [vmem:[%s903_s26 + $0x21] sm:$0xff] %vm471_vm3, %v454_v62  ;;  %474 = vst.msk [vmem:[%s903_s26 + $0x19] sm:$0xff] %vm471_vm3, %v452_v63 }
 0x129   : > { %v458_v0 = vpop.permute.xlu1 %457  ;;  %v456_v1 = vpop.permute.xlu0 %455 }
 0x12a   : > { %477 = vst.msk [vmem:[%s903_s26 + $0x39] sm:$0xff] %vm471_vm3, %v458_v0  ;;  %476 = vst.msk [vmem:[%s903_s26 + $0x31] sm:$0xff] %vm471_vm3, %v456_v1 }
 0x12d   : > { %v462_v2 = vpop.permute.xlu1 %461  ;;  %v460_v3 = vpop.permute.xlu0 %459 }
 0x12e   : > { %479 = vst.msk [vmem:[%s903_s26 + $0x51] sm:$0xff] %vm471_vm3, %v462_v2  ;;  %478 = vst.msk [vmem:[%s903_s26 + $0x49] sm:$0xff] %vm471_vm3, %v460_v3 }
 0x12f PF: > { %s16_s17 = sadd.s32 1, %s765_s17   ;;  %s1006_s12 = smov %s749_s13 }
 0x130   : > { %p13_p8 = scmp.ge.s32.totalorder %s16_s17, 4   ;;  %s1007_s13 = smov %s753_s14 }
 0x131   : > { %s1008_s14 = smov %s842_s24  ;;  %s1009_s15 = smov %s761_s16 }
 0x132   : > { %s1010_s16 = smov %s1012_s19  ;;  %15 = sbr.rel (!%p13_p8) target bundleno = 4 (0x4), region = 78 }
 0x137   :  { %512 = vsyncpa [#allocation3], 1 }
 0x138   :  { %514 = vsyncpa [#allocation3 + $0x1], 1 }

</bundles_post_ra>
